<compile_context>
chip_gen: v6e
topology: v6e:2x2x1
jax: 0.10.0
libtpu: 0.0.40
codegen_flags: <defaults>
</compile_context>

<pallas_src>
import jax
import jax.numpy as jnp
from jax.experimental import pallas as pl
from jax.experimental.pallas import tpu as pltpu

_LANE = 128
_SUBLANE = 8


def _round_up(x, m):
    return ((x + m - 1) // m) * m


def _vmem_limit_bytes():
    """Chip-adaptive scoped-VMEM limit: ~3/4 of physical (v5e/v6e -> 96 MiB, v7x -> 48 MiB)."""
    try:
        info = pltpu.get_tpu_info()
        cap = getattr(info, "vmem_capacity_bytes", 64 * 1024 * 1024)
    except Exception:
        cap = 64 * 1024 * 1024
    return int(min(cap * 3 // 4, 100 * 1024 * 1024))


def _sage_vgae_kernel(a_ref, xk_ref, xm_ref, dinv_ref, w_ref, o_ref, acc_ref):
    """Tiled SAGE/VGAE encoder body.

    grid = (row tiles of the count matrix C, reduction tiles over the source-node axis).
    acc (f32 VMEM scratch) accumulates the neighbor-sum C @ x across the k axis; on the last k
    step the exact f32 1/deg scale is applied and one fused projection
    [agg || x_self] @ [[Wl];[Wr]] is written as a lane-dense (mu||logstd) tile.
    """
    k = pl.program_id(1)

    @pl.when(k == 0)
    def _init():
        acc_ref[...] = jnp.zeros_like(acc_ref)

    # Neighbor-sum partial product on the MXU (narrow storage in, f32 accumulation out).
    acc_ref[...] += jnp.dot(a_ref[...], xk_ref[...],
                            preferred_element_type=jnp.float32)

    @pl.when(k == pl.num_programs(1) - 1)
    def _finalize():
        # Exact mean: scale integer-count neighbor sums by the f32 1/deg column (free VPU op).
        agg = acc_ref[...] * dinv_ref[...]
        x_self = xm_ref[...].astype(jnp.float32)
        # Single fused MXU push: K = 2*f_in instead of two K = f_in dots.
        cat = jnp.concatenate([agg, x_self], axis=-1)
        o_ref[...] = jnp.dot(cat, w_ref[...], preferred_element_type=jnp.float32)


def init_params(key, in_size, out_size):
    """Deterministic synthetic parameters matching SAGEConv's lin_l / lin_r shapes."""
    ks = jax.random.split(key, 6)
    scale = 1.0 / jnp.sqrt(jnp.float32(in_size))
    mk = lambda k, shape: jax.random.normal(k, shape, jnp.float32) * scale
    return {
        # stored as [in, out] (transpose of torch.nn.Linear weight [out, in])
        "wl_mu": mk(ks[0], (in_size, out_size)),
        "wr_mu": mk(ks[1], (in_size, out_size)),
        "b_mu":  mk(ks[2], (1, out_size)),
        "wl_ls": mk(ks[3], (in_size, out_size)),
        "wr_ls": mk(ks[4], (in_size, out_size)),
        "b_ls":  mk(ks[5], (1, out_size)),
    }


def ppi_encoder1(x, edge_index, params, *, tm=1024, tk=2048,
                 storage_dtype=jnp.bfloat16):
    """Forward pass of PPIEncoder1: returns (mu, logstd)."""
    n, f_in = x.shape
    f_out = params["wl_mu"].shape[1]

    # ---- tile sizes -------------------------------------------------------------------------
    tm = _round_up(min(tm, _round_up(n, _SUBLANE)), _SUBLANE)
    tk = _round_up(min(tk, _round_up(n, _LANE)), _LANE)
    # Keep >= 2 row tiles when the graph is big enough so the "parallel" row axis can shard
    # across v7x's two TensorCores instead of idling one.
    if n > 2 * _SUBLANE and _round_up(n, tm) // tm < 2:
        tm = _round_up((n + 1) // 2, _SUBLANE)

    rows_pad = _round_up(n, tm)   # destination-node (output row) padding
    cols_pad = _round_up(n, tk)   # source-node (reduction) padding

    # ---- graph glue (stays in plain JAX) ----------------------------------------------------
    # Integer edge counts built directly at the padded shape (no separate pad pass); the 1/deg
    # factor is kept exact in f32 and applied inside the kernel at finalize time.
    src = edge_index[0]
    dst = edge_index[1]
    counts = jnp.zeros((rows_pad, cols_pad), jnp.float32).at[dst, src].add(1.0)
    deg = counts.sum(axis=1, keepdims=True)
    deg_inv = (1.0 / jnp.maximum(deg, 1.0)).astype(jnp.float32)      # (rows_pad, 1)
    counts_s = counts.astype(storage_dtype)                          # narrow A stream (exact ints)

    # x padded independently for the neighbor (reduction) path and the self path.
    x_k = jnp.zeros((cols_pad, f_in), storage_dtype).at[:n, :].set(x.astype(storage_dtype))
    x_m = jnp.zeros((rows_pad, f_in), storage_dtype).at[:n, :].set(x.astype(storage_dtype))

    # ---- fused resident weight: rows = [Wl ; Wr], cols = [mu | logstd], lane-padded ----------
    f_out2 = 2 * f_out
    f_out_pad = _round_up(f_out2, _LANE)
    w_cat = jnp.zeros((2 * f_in, f_out_pad), jnp.float32)
    w_cat = w_cat.at[:f_in, :f_out].set(params["wl_mu"])
    w_cat = w_cat.at[:f_in, f_out:f_out2].set(params["wl_ls"])
    w_cat = w_cat.at[f_in:, :f_out].set(params["wr_mu"])
    w_cat = w_cat.at[f_in:, f_out:f_out2].set(params["wr_ls"])

    grid = (rows_pad // tm, cols_pad // tk)

    out = pl.pallas_call(
        _sage_vgae_kernel,
        out_shape=jax.ShapeDtypeStruct((rows_pad, f_out_pad), jnp.float32),
        grid_spec=pltpu.PrefetchScalarGridSpec(
            num_scalar_prefetch=0,
            grid=grid,
            in_specs=[
                pl.BlockSpec((tm, tk), lambda i, k: (i, k)),           # C tile (big HBM stream)
                pl.BlockSpec((tk, f_in), lambda i, k: (k, 0)),         # x, neighbor path
                pl.BlockSpec((tm, f_in), lambda i, k: (i, 0)),         # x, self path
                pl.BlockSpec((tm, 1), lambda i, k: (i, 0)),            # 1/deg (f32, exact)
                pl.BlockSpec((2 * f_in, f_out_pad), lambda i, k: (0, 0)),  # [Wl;Wr] resident
            ],
            out_specs=pl.BlockSpec((tm, f_out_pad), lambda i, k: (i, 0)),
            scratch_shapes=[pltpu.VMEM((tm, f_in), jnp.float32)],
        ),
        compiler_params=pltpu.CompilerParams(
            dimension_semantics=("parallel", "arbitrary"),
            vmem_limit_bytes=_vmem_limit_bytes(),
        ),
    )(counts_s, x_k, x_m, deg_inv, w_cat)

    fused = out[:n, :f_out2]
    mu = fused[:, :f_out] + params["b_mu"]
    logstd = fused[:, f_out:] + params["b_ls"]
    return mu, logstd


def _reference(x, edge_index, params):
    """Pure-JAX f32 reference for sanity checking."""
    n = x.shape[0]
    src, dst = edge_index[0], edge_index[1]
    counts = jnp.zeros((n, n), jnp.float32).at[dst, src].add(1.0)
    deg = counts.sum(axis=1, keepdims=True)
    agg = (counts / jnp.maximum(deg, 1.0)) @ x
    mu = agg @ params["wl_mu"] + x @ params["wr_mu"] + params["b_mu"]
    ls = agg @ params["wl_ls"] + x @ params["wr_ls"] + params["b_ls"]
    return mu, ls


if __name__ == "__main__":
    key = jax.random.PRNGKey(0)
    k_x, k_e, k_p, k_x2, k_e2, k_p2 = jax.random.split(key, 6)

    # --- small single-tile case -----------------------------------------------------------
    n1, f_in1, f_out1, e1 = 16, 16, 8, 32
    x1 = jax.random.normal(k_x, (n1, f_in1), jnp.float32)
    ei1 = jax.random.randint(k_e, (2, e1), 0, n1, jnp.int32)
    p1 = init_params(k_p, f_in1, f_out1)
    mu_ref, ls_ref = _reference(x1, ei1, p1)

    # f32 storage path: exact match with the reference.
    mu, ls = ppi_encoder1(x1, ei1, p1, storage_dtype=jnp.float32)
    jax.block_until_ready((mu, ls))
    assert jnp.allclose(mu, mu_ref, atol=1e-4), "mu mismatch (f32)"
    assert jnp.allclose(ls, ls_ref, atol=1e-4), "logstd mismatch (f32)"

    # Default bf16 storage path: exact integer counts + f32 1/deg, features bf16-rounded.
    mu_b, ls_b = ppi_encoder1(x1, ei1, p1)
    jax.block_until_ready((mu_b, ls_b))
    assert jnp.allclose(mu_b, mu_ref, atol=5e-2, rtol=5e-2), "mu mismatch (bf16)"
    assert jnp.allclose(ls_b, ls_ref, atol=5e-2, rtol=5e-2), "logstd mismatch (bf16)"

    # --- multi-tile case: exercises the (row, reduction) grid and the k-axis accumulator ----
    n2, f_in2, f_out2, e2 = 300, 32, 16, 1200
    x2 = jax.random.normal(k_x2, (n2, f_in2), jnp.float32)
    ei2 = jax.random.randint(k_e2, (2, e2), 0, n2, jnp.int32)
    p2 = init_params(k_p2, f_in2, f_out2)
    mu2, ls2 = ppi_encoder1(x2, ei2, p2, tm=128, tk=128, storage_dtype=jnp.float32)
    jax.block_until_ready((mu2, ls2))
    mu2_ref, ls2_ref = _reference(x2, ei2, p2)
    assert jnp.allclose(mu2, mu2_ref, atol=1e-3, rtol=1e-3), "mu mismatch (multi-tile)"
    assert jnp.allclose(ls2, ls2_ref, atol=1e-3, rtol=1e-3), "logstd mismatch (multi-tile)"

    print("KERNEL_OK")
</pallas_src>

<mosaic_0001>
module attributes {stable_mosaic.version = 11 : i64} {
  func.func @_sage_vgae_kernel(%arg0: i32, %arg1: i32, %arg2: memref<16x128xf32, #tpu.memory_space<vmem>>, %arg3: memref<128x16xf32, #tpu.memory_space<vmem>>, %arg4: memref<16x16xf32, #tpu.memory_space<vmem>>, %arg5: memref<16x1xf32, #tpu.memory_space<vmem>>, %arg6: memref<32x128xf32, #tpu.memory_space<vmem>>, %arg7: memref<16x128xf32, #tpu.memory_space<vmem>>, %arg8: memref<16x16xf32, #tpu.memory_space<vmem>>) attributes {dimension_semantics = [#tpu.dimension_semantics<parallel>, #tpu.dimension_semantics<arbitrary>], iteration_bounds = array<i64: 1, 1>, scalar_prefetch = 0 : i64, scratch_operands = 1 : i64, tpu.core_type = #tpu.core_type<tc>, window_params = [{transform_indices = @transform_0, window_bounds = array<i64: 16, 128>}, {transform_indices = @transform_1, window_bounds = array<i64: 128, 16>}, {transform_indices = @transform_2, window_bounds = array<i64: 16, 16>}, {transform_indices = @transform_3, window_bounds = array<i64: 16, 1>}, {pipeline_mode = #tpu.pipeline_mode<synchronous>, transform_indices = @transform_4, window_bounds = array<i64: 32, 128>}, {transform_indices = @transform_5, window_bounds = array<i64: 16, 128>}]} {
    %c0_i32 = arith.constant 0 : i32
    %0 = arith.cmpi eq, %arg1, %c0_i32 : i32
    %1 = arith.extui %0 : i1 to i32
    %c0_i32_0 = arith.constant 0 : i32
    %2 = arith.cmpi ne, %1, %c0_i32_0 : i32
    scf.if %2 {
      %cst_10 = arith.constant 0.000000e+00 : f32
      %12 = vector.broadcast %cst_10 : f32 to vector<16x16xf32>
      %c0_11 = arith.constant 0 : index
      %c0_12 = arith.constant 0 : index
      %13 = vector.load %arg8[%c0_11, %c0_12] : memref<16x16xf32, #tpu.memory_space<vmem>>, vector<16x16xf32>
      tpu.vector_store %arg8[%c0_11, %c0_12], %12 {strides = array<i32>} : memref<16x16xf32, #tpu.memory_space<vmem>>, vector<16x16xf32>,
    } else {
    }
    %c0 = arith.constant 0 : index
    %c0_1 = arith.constant 0 : index
    %3 = vector.load %arg8[%c0, %c0_1] : memref<16x16xf32, #tpu.memory_space<vmem>>, vector<16x16xf32>
    %c0_2 = arith.constant 0 : index
    %c0_3 = arith.constant 0 : index
    %4 = vector.load %arg2[%c0_2, %c0_3] : memref<16x128xf32, #tpu.memory_space<vmem>>, vector<16x128xf32>
    %c0_4 = arith.constant 0 : index
    %c0_5 = arith.constant 0 : index
    %5 = vector.load %arg3[%c0_4, %c0_5] : memref<128x16xf32, #tpu.memory_space<vmem>>, vector<128x16xf32>
    %cst = arith.constant dense<0.000000e+00> : vector<16x16xf32>
    %6 = tpu.matmul %4, %5, %cst {dimension_numbers = #tpu.dot_dimension_numbers<[1], [0], [0], [1], [0, 0, 1, 1], [], []>} : vector<16x128xf32>, vector<128x16xf32>, vector<16x16xf32> -> vector<16x16xf32>
    %7 = arith.addf %3, %6 : vector<16x16xf32>
    %c0_6 = arith.constant 0 : index
    %c0_7 = arith.constant 0 : index
    %8 = vector.load %arg8[%c0_6, %c0_7] : memref<16x16xf32, #tpu.memory_space<vmem>>, vector<16x16xf32>
    tpu.vector_store %arg8[%c0_6, %c0_7], %7 {strides = array<i32>} : memref<16x16xf32, #tpu.memory_space<vmem>>, vector<16x16xf32>,
    %c0_i32_8 = arith.constant 0 : i32
    %9 = arith.cmpi eq, %arg1, %c0_i32_8 : i32
    %10 = arith.extui %9 : i1 to i32
    %c0_i32_9 = arith.constant 0 : i32
    %11 = arith.cmpi ne, %10, %c0_i32_9 : i32
    scf.if %11 {
      %c0_10 = arith.constant 0 : index
      %c0_11 = arith.constant 0 : index
      %12 = vector.load %arg8[%c0_10, %c0_11] : memref<16x16xf32, #tpu.memory_space<vmem>>, vector<16x16xf32>
      %c0_12 = arith.constant 0 : index
      %c0_13 = arith.constant 0 : index
      %13 = vector.load %arg5[%c0_12, %c0_13] : memref<16x1xf32, #tpu.memory_space<vmem>>, vector<16x1xf32>
      %14 = vector.broadcast %13 : vector<16x1xf32> to vector<16x16xf32>
      %15 = arith.mulf %12, %14 : vector<16x16xf32>
      %c0_14 = arith.constant 0 : index
      %c0_15 = arith.constant 0 : index
      %16 = vector.load %arg4[%c0_14, %c0_15] : memref<16x16xf32, #tpu.memory_space<vmem>>, vector<16x16xf32>
      %17 = tpu.concatenate %15, %16 in 1 : vector<16x16xf32>, vector<16x16xf32> -> vector<16x32xf32>
      %c0_16 = arith.constant 0 : index
      %c0_17 = arith.constant 0 : index
      %18 = vector.load %arg6[%c0_16, %c0_17] : memref<32x128xf32, #tpu.memory_space<vmem>>, vector<32x128xf32>
      %cst_18 = arith.constant dense<0.000000e+00> : vector<16x128xf32>
      %19 = tpu.matmul %17, %18, %cst_18 {dimension_numbers = #tpu.dot_dimension_numbers<[1], [0], [0], [1], [0, 0, 1, 1], [], []>} : vector<16x32xf32>, vector<32x128xf32>, vector<16x128xf32> -> vector<16x128xf32>
      %c0_19 = arith.constant 0 : index
      %c0_20 = arith.constant 0 : index
      %20 = vector.load %arg7[%c0_19, %c0_20] : memref<16x128xf32, #tpu.memory_space<vmem>>, vector<16x128xf32>
      tpu.vector_store %arg7[%c0_19, %c0_20], %19 {strides = array<i32>} : memref<16x128xf32, #tpu.memory_space<vmem>>, vector<16x128xf32>,
    } else {
    }
    return
  }
  func.func @transform_0(%arg0: i32, %arg1: i32) -> (i32, i32) {
    %c0_i32 = arith.constant 0 : i32
    return %arg0, %arg1 : i32, i32
  }
  func.func @transform_1(%arg0: i32, %arg1: i32) -> (i32, i32) {
    %c0_i32 = arith.constant 0 : i32
    %c0_i32_0 = arith.constant 0 : i32
    return %arg1, %c0_i32 : i32, i32
  }
  func.func @transform_2(%arg0: i32, %arg1: i32) -> (i32, i32) {
    %c0_i32 = arith.constant 0 : i32
    %c0_i32_0 = arith.constant 0 : i32
    return %arg0, %c0_i32 : i32, i32
  }
  func.func @transform_3(%arg0: i32, %arg1: i32) -> (i32, i32) {
    %c0_i32 = arith.constant 0 : i32
    %c0_i32_0 = arith.constant 0 : i32
    return %arg0, %c0_i32 : i32, i32
  }
  func.func @transform_4(%arg0: i32, %arg1: i32) -> (i32, i32) {
    %c0_i32 = arith.constant 0 : i32
    %c0_i32_0 = arith.constant 0 : i32
    %c0_i32_1 = arith.constant 0 : i32
    return %c0_i32, %c0_i32_0 : i32, i32
  }
  func.func @transform_5(%arg0: i32, %arg1: i32) -> (i32, i32) {
    %c0_i32 = arith.constant 0 : i32
    %c0_i32_0 = arith.constant 0 : i32
    return %arg0, %c0_i32 : i32, i32
  }
}

</mosaic_0001>

<bundles_post_ra>
// kernel: tpu_custom_call.1
= control target key start
LH: loop header
LB: loop body
LE: loop exit
PB: predicated region body
PF: predicated region fallthrough
CT: control target
= control target key end

     0   :  { %vm25_vm0 = vcmask 130048   ;;  %v364_v2 = vmov 0   ;;  %v365_v4 = vmov 0.0   ;;  %s487_s0 = inlined_call_operand.vmem [shape: f32[16,128], index: 0, kind: input, shape index: {}]   ;;  %s488_s1 = inlined_call_operand.vmem [shape: f32[128,16], index: 1, kind: input, shape index: {}]   ;;  %s489_s2 = inlined_call_operand.vmem [shape: f32[16,16], index: 2, kind: input, shape index: {}]   ;;  %s490_s3 = inlined_call_operand.vmem [shape: f32[16,1], index: 3, kind: input, shape index: {}]   ;;  %s491_s4 = inlined_call_operand.vmem [shape: f32[32,128], index: 4, kind: input, shape index: {}]   ;;  %s492_s5 = inlined_call_operand.hbm [shape: f32[16,128], index: 5, kind: output, shape index: {}]  }
   0x1   :  { %v47_v0 = vld [vmem:[%s488_s1 + $0x78] sm:$0xff]  ;;  %v46_v1 = vld [vmem:[%s488_s1 + $0x70] sm:$0xff]  ;;  %341 = vset.pattern.permute.xlu0 %v364_v2  ;;  %v45_v3 = vld [vmem:[%s488_s1 + $0x68] sm:$0xff]  ;;  %27 = vst.msk [vmem:[#allocation2 + $0x8] sm:$0xff] %vm25_vm0, %v365_v4 }
   0x2   :  { %289 = vmatprep.subr.mxu0 %v47_v0  ;;  %26 = vst.msk [vmem:[#allocation2] sm:$0xff] %vm25_vm0, %v365_v4  ;;  %v44_v5 = vld [vmem:[%s488_s1 + $0x60] sm:$0xff]  ;;  %v43_v7 = vld [vmem:[%s488_s1 + $0x58] sm:$0xff] }
   0x3   :  { %290 = vmatpush3.msra.mxu0 %v47_v0  ;;  %v30_v6 = vld [vmem:[%s487_s0] sm:$0xff] }
   0x4   :  { %291 = vmatprep.subr.mxu0 %v46_v1  ;;  %321 = vmatprep.mubr.f32.mxu0 %v30_v6  ;;  %v133_v8 = vld [vmem:[%s490_s3] sm:$0xff] }
   0x5   :  { %292 = vmatpush3.msra.mxu0 %v46_v1  ;;  %v147_v9 = vld [vmem:[%s489_s2] sm:$0xff]  ;;  %137 = vperm.xlu0 %341, %v133_v8  }
   0x6   :  { %293 = vmatprep.subr.mxu0 %v45_v3 }
   0x7   :  { %294 = vmatpush3.msra.mxu0 %v45_v3 }
   0x8   :  { %295 = vmatprep.subr.mxu0 %v44_v5 }
   0x9   :  { %10 = vsyncpa [#allocation4], 0  ;;  %296 = vmatpush3.msra.mxu0 %v44_v5  ;;  %v42_v10 = vld [vmem:[%s488_s1 + $0x50] sm:$0xff]  ;;  %v134_v11 = vld [vmem:[%s490_s3 + $0x8] sm:$0xff]  ;;  %s366_s13 = smov 16   ;;  %vm163_vm1 = vcmask 261120  }
   0xa   :  { %151 = vrot.lane.b32.xlu1 %v147_v9, %s366_s13  ;;  %297 = vmatprep.subr.mxu0 %v43_v7  ;;  %v148_v12 = vld [vmem:[%s489_s2 + $0x8] sm:$0xff]  ;;  %v40_v14 = vld [vmem:[%s488_s1 + $0x40] sm:$0xff]  ;;  %v39_v15 = vld [vmem:[%s488_s1 + $0x38] sm:$0xff] }
   0xb   :  { %298 = vmatpush3.msra.mxu0 %v43_v7  ;;  %v41_v13 = vld [vmem:[%s488_s1 + $0x48] sm:$0xff]  ;;  %142 = vperm.xlu0 %341, %v134_v11   ;;  %v38_v16 = vld [vmem:[%s488_s1 + $0x30] sm:$0xff]  ;;  %v36_v18 = vld [vmem:[%s488_s1 + $0x20] sm:$0xff] }
   0xc   :  { %299 = vmatprep.subr.mxu0 %v42_v10  ;;  %v37_v17 = vld [vmem:[%s488_s1 + $0x28] sm:$0xff]  ;;  %v35_v19 = vld [vmem:[%s488_s1 + $0x18] sm:$0xff]  ;;  %v34_v20 = vld [vmem:[%s488_s1 + $0x10] sm:$0xff] }
   0xd   :  { %300 = vmatpush3.msra.mxu0 %v42_v10  ;;  %v33_v21 = vld [vmem:[%s488_s1 + $0x8] sm:$0xff]  ;;  %v32_v22 = vld [vmem:[%s488_s1] sm:$0xff]  ;;  %v162_v24 = vld [vmem:[%s491_s4 + $0x18] sm:$0xff] }
   0xe   :  { %153 = vrot.lane.b32.xlu1 %v148_v12, %s366_s13  ;;  %301 = vmatprep.subr.mxu0 %v41_v13  ;;  %v31_v23 = vld [vmem:[%s487_s0 + $0x8] sm:$0xff]  ;;  %v161_v25 = vld [vmem:[%s491_s4 + $0x10] sm:$0xff]  ;;  %v159_v27 = vld [vmem:[%s491_s4] sm:$0xff] }
   0xf   :  { %302 = vmatpush3.msra.mxu0 %v41_v13  ;;  %324 = vmatprep.subr.mxu1 %v162_v24  ;;  %v160_v26 = vld [vmem:[%s491_s4 + $0x8] sm:$0xff]  ;;  %v28_v30 = vld [vmem:[#allocation2] sm:$0xff]  ;;  %s367_s4 = smov [#allocation3]  }
  0x10   :  { %303 = vmatprep.subr.mxu0 %v40_v14  ;;  %325 = vmatpush3.msra.mxu1 %v162_v24  ;;  %v29_v28 = vld [vmem:[#allocation2 + $0x8] sm:$0xff]  ;;  %s252_s17 = sshll.u32 %s367_s4, 4  ;;  %s253_s17 = int_to_ptr.vmem [resolvable:$true] %s252_s17 }
  0x11   :  { %304 = vmatpush3.msra.mxu0 %v40_v14  ;;  %326 = vmatprep.subr.mxu1 %v161_v25  ;;  %s342_s18 = scalar_lea.vmem %s253_s17, 256  ;;  %p347_p1 = scmp.lt.s32.totalorder %s253_s17, %s253_s17 }
  0x12   :  { %305 = vmatprep.subr.mxu0 %v39_v15  ;;  %327 = vmatpush3.msra.mxu1 %v161_v25  ;;  %p343_p0 = scmp.ne.s32.totalorder %s253_s17, %s342_s18  ;;  %p348_p2 = scmp.lt.s32.totalorder %s342_s18, %s342_s18 }
  0x13   :  { %306 = vmatpush3.msra.mxu0 %v39_v15  ;;  %328 = vmatprep.subr.mxu1 %v160_v26 }
  0x14   :  { %307 = vmatprep.subr.mxu0 %v38_v16  ;;  %329 = vmatpush3.msra.mxu1 %v160_v26  ;;  %p349_p3 = por %p348_p2, %p347_p1 }
  0x15   :  { %308 = vmatpush3.msra.mxu0 %v38_v16  ;;  %330 = vmatprep.subr.mxu1 %v159_v27 }
  0x16   :  { %309 = vmatprep.subr.mxu0 %v37_v17  ;;  %331 = vmatpush3.msra.mxu1 %v159_v27  ;;  %p350_p4 = pnand %p349_p3, %p343_p0 }
  0x17   :  { %310 = vmatpush3.msra.mxu0 %v37_v17 }
  0x18   :  { %311 = vmatprep.subr.mxu0 %v36_v18 }
  0x19   :  { %312 = vmatpush3.msra.mxu0 %v36_v18 }
  0x1a   :  { %313 = vmatprep.subr.mxu0 %v35_v19 }
  0x1b   :  { %314 = vmatpush3.msra.mxu0 %v35_v19 }
  0x1c   :  { %315 = vmatprep.subr.mxu0 %v34_v20 }
  0x1d   :  { %316 = vmatpush3.msra.mxu0 %v34_v20 }
  0x1e   :  { %317 = vmatprep.subr.mxu0 %v33_v21 }
  0x1f   :  { %318 = vmatpush3.msra.mxu0 %v33_v21 }
  0x20   :  { %319 = vmatprep.subr.mxu0 %v32_v22 }
  0x21   :  { %320 = vmatpush3.msra.mxu0 %v32_v22 }
  0x22   :  { %322 = vmatmul.mubr.f32.vlgmr.msra.gmra.mxu0 %v31_v23 }
  0x7c   :  { %v152_v35 = vpop.permute.xlu1 %151 }
  0x80   :  { %v138_v34 = vpop.permute.xlu0 %137  ;;  %v154_v41 = vpop.permute.xlu1 %153 }
  0x86   :  { %v143_v36 = vpop.permute.xlu0 %142 }
  0xe2   :  { %v323_v29 = vpop.f32.mrf.mxu0 }
  0xe3   :  { %v124_v31 = vadd.f32 %v323_v29, %v29_v28 }
  0xe4   :  { %v114_v32 = vpop.f32.mrf.mxu0 }
  0xe5   :  { %127 = vst.msk [vmem:[#allocation2 + $0x8] sm:$0xff] %vm25_vm0, %v124_v31  ;;  %v123_v33 = vadd.f32 %v114_v32, %v28_v30 }
  0xe7   :  { %126 = vst.msk [vmem:[#allocation2] sm:$0xff] %vm25_vm0, %v123_v33 }
  0xec   :  { %v132_v37 = vld [vmem:[#allocation2 + $0x8] sm:$0xff] }
  0xed   :  { %v146_v39 = vmul.f32 %v143_v36, %v132_v37 }
  0xee   :  { %v131_v38 = vld [vmem:[#allocation2] sm:$0xff] }
  0xef   :  { %v145_v40 = vmul.f32 %v138_v34, %v131_v38  ;;  %v158_v43 = vsel %vm25_vm0, %v146_v39, %v154_v41 }
  0xf1   :  { %v157_v42 = vsel %vm25_vm0, %v145_v40, %v152_v35 }
  0xf2   :  { %332 = vmatprep.mubr.msk.f32.mxu1 %vm163_vm1, %v157_v42 }
  0xf3   :  { %333 = vmatmul.mubr.msk.f32.vlgmr.msra.gmra.mxu1 %vm163_vm1, %v158_v43 }
 0x1b3   :  { %v334_v44 = vpop.f32.mrf.mxu1 }
 0x1b4   :  { %246 = vst [vmem:[#allocation3 + $0x8] sm:$0xff] %v334_v44 }
 0x1b5   :  { %v236_v45 = vpop.f32.mrf.mxu1 }
 0x1b6   :  { %245 = vst [vmem:[#allocation3] sm:$0xff] %v236_v45 }
 0x1b7   :  { %353 = shalt.err (!%p350_p4)
}
 0x1b8   :  { %s368_s19 = smov 128   ;;  %s369_s3 = smov 8  }
 0x1b9   :  { %258 = dma.vmem_to_hbm [thread:$0]  %s253_s17, 256, %s492_s5, [#allocation4], %s368_s19, %s368_s19, %s369_s3  }
 0x1ba   :  { %362 = dma.done.wait [#allocation4], 256  }
 0x1bb   :  { %363 = vsyncadd [#allocation4], 4294967040 }
 0x1bc   :  { %262 = vsyncpa [#allocation4], 1 }

</bundles_post_ra>
